<compile_context>
chip_gen: v6e
topology: v6e:2x2x1
jax: 0.10.0
libtpu: 0.0.40
codegen_flags: <defaults>
</compile_context>

<pallas_src>
import functools

import jax
import jax.numpy as jnp
from jax import lax
from jax.experimental import pallas as pl
from jax.experimental.pallas import tpu as pltpu


def _pos_lstm_kernel(ids_ref, w_ref, b_ref, out_ref, *,
                     L, V, H, G, Tpad, off_ep, off_hh, off_tag):
    # ids_ref : (L, 1)   int32   token ids of this sentence (grid step)
    # w_ref   : (R, LW)  bf16    packed [emb_proj | w_hh | w_tag] slab
    # b_ref   : (2, LW)  f32     row 0 = folded LSTM bias, row 1 = tag bias
    # out_ref : (L, Tpad) f32    lane-padded tag_space (wrapper slices [:T])

    # ---- Embedding lookup + input projection as ONE bf16 one-hot matmul ----
    ids = ids_ref[...]                                           # (L, 1) int32
    lane_iota = lax.broadcasted_iota(jnp.int32, (L, V), 1)       # (L, V)
    onehot = (ids == lane_iota).astype(jnp.bfloat16)             # (L, V) bf16
    emb_proj = w_ref[off_ep:off_ep + V, 0:G]                     # (V, G) bf16
    x_proj = (jnp.dot(onehot, emb_proj,
                      preferred_element_type=jnp.float32)
              + b_ref[0:1, 0:G])                                 # (L, G) f32

    w_hh = w_ref[off_hh:off_hh + H, 0:G]                         # (H, G) bf16
    w_tag = w_ref[off_tag:off_tag + H, 0:Tpad]                   # (H, Tpad) bf16
    b_tag = b_ref[1:2, 0:Tpad]                                   # (1, Tpad) f32

    h = jnp.zeros((1, H), jnp.float32)
    c = jnp.zeros((1, H), jnp.float32)
    h_mm = h.astype(jnp.bfloat16)
    # L is a small static trip count: fully unrolled, every slice is static.
    for t in range(L):
        gates = x_proj[t:t + 1, :] + jnp.dot(
            h_mm, w_hh, preferred_element_type=jnp.float32)      # (1, G) f32
        # Two full-vreg EUP pushes; PyTorch gate order (i, f, g, o).
        sig = jax.nn.sigmoid(gates)
        tnh = jnp.tanh(gates)
        i_g = sig[:, 0:H]
        f_g = sig[:, H:2 * H]
        g_g = tnh[:, 2 * H:3 * H]
        o_g = sig[:, 3 * H:4 * H]
        c = f_g * c + i_g * g_g
        h = o_g * jnp.tanh(c)
        h_mm = h.astype(jnp.bfloat16)
        # Per-step hidden2tag matmul + row store: off the recurrence's
        # critical path, and removes the sublane-concat epilogue entirely.
        out_ref[t:t + 1, :] = jnp.dot(
            h_mm, w_tag, preferred_element_type=jnp.float32) + b_tag


def pos_lstm_forward(sentences, params):
    """sentences: int32 (N, L) or (L,).  Returns tag_space (N, L, T) / (L, T)."""
    meta = params["meta"]
    squeeze = sentences.ndim == 1
    if squeeze:
        sentences = sentences[None, :]
    N, L = int(sentences.shape[0]), int(sentences.shape[1])
    V, H, G, Tpad, T = meta["V"], meta["H"], meta["G"], meta["Tpad"], meta["T"]
    ids = sentences.astype(jnp.int32).reshape(N, L, 1)

    kernel = functools.partial(
        _pos_lstm_kernel, L=L, V=V, H=H, G=G, Tpad=Tpad,
        off_ep=meta["off_ep"], off_hh=meta["off_hh"], off_tag=meta["off_tag"])

    w_slab = params["w_slab"]
    b_slab = params["b_slab"]
    out = pl.pallas_call(
        kernel,
        out_shape=jax.ShapeDtypeStruct((N, L, Tpad), jnp.float32),
        grid=(N,),
        in_specs=[
            # one sentence of ids per grid step (leading dim squeezed)
            pl.BlockSpec((None, L, 1), lambda s: (s, 0, 0)),
            # packed weight / bias slabs: constant block index -> resident in
            # VMEM, fetched once and reused by every grid step.
            pl.BlockSpec(w_slab.shape, lambda s: (0, 0)),
            pl.BlockSpec(b_slab.shape, lambda s: (0, 0)),
        ],
        out_specs=pl.BlockSpec((None, L, Tpad), lambda s: (s, 0, 0)),
        compiler_params=pltpu.CompilerParams(
            dimension_semantics=("parallel",)),  # shards sentences across TCs on v7x
    )(ids, w_slab, b_slab)

    out = out[:, :, :T]
    return out[0] if squeeze else out


def init_params(key, vocab_size, embedding_dim, hidden_dim, target_size):
    """Deterministic init mirroring nn.Embedding / nn.LSTM / nn.Linear shapes.

    Matmul weights are stored pre-transposed ([in, out]), the embedding is
    pre-multiplied by w_ih (folded), all MXU operands are bf16, and everything
    is packed into two slabs (one bf16, one f32) to minimize DMA descriptors.
    """
    V, E, H, T = vocab_size, embedding_dim, hidden_dim, target_size
    G = 4 * H
    Tpad = max(128, -(-T // 128) * 128)          # lane-dense tag width
    LW = max(G, Tpad)

    ks = jax.random.split(key, 7)
    k_lstm = 1.0 / jnp.sqrt(hidden_dim)
    emb = jax.random.normal(ks[0], (V, E), jnp.float32)
    w_ih = jax.random.uniform(ks[1], (E, G), jnp.float32, -k_lstm, k_lstm)
    w_hh = jax.random.uniform(ks[2], (H, G), jnp.float32, -k_lstm, k_lstm)
    b_ih = jax.random.uniform(ks[3], (1, G), jnp.float32, -k_lstm, k_lstm)
    b_hh = jax.random.uniform(ks[4], (1, G), jnp.float32, -k_lstm, k_lstm)
    w_tag = jax.random.uniform(ks[5], (H, T), jnp.float32, -k_lstm, k_lstm)
    b_tag = jax.random.uniform(ks[6], (1, T), jnp.float32, -k_lstm, k_lstm)

    # Fold embedding @ w_ih once (f32) then cast: the in-kernel bf16 one-hot
    # matmul selects a pre-projected row exactly.
    emb_proj = (emb @ w_ih).astype(jnp.bfloat16)                 # (V, G)

    def _pad_block(blk):
        r, c = blk.shape
        rp = -(-r // 16) * 16                                    # bf16 sublane pack
        padded = jnp.zeros((rp, LW), jnp.bfloat16)
        return padded.at[:r, :c].set(blk.astype(jnp.bfloat16)), rp

    padded, offsets, row = [], [], 0
    for blk in (emb_proj, w_hh, w_tag):
        p, rp = _pad_block(blk)
        padded.append(p)
        offsets.append(row)
        row += rp
    w_slab = jnp.concatenate(padded, axis=0)                     # (R, LW) bf16

    b_slab = jnp.zeros((2, LW), jnp.float32)
    b_slab = b_slab.at[0, :G].set((b_ih + b_hh)[0])
    b_slab = b_slab.at[1, :T].set(b_tag[0])

    meta = dict(V=V, E=E, H=H, T=T, G=G, Tpad=Tpad, LW=LW,
                off_ep=offsets[0], off_hh=offsets[1], off_tag=offsets[2])
    return {
        "w_slab": w_slab, "b_slab": b_slab, "meta": meta,
        # raw f32 copies kept only for the pure-JAX reference check
        "emb": emb, "w_ih": w_ih, "w_hh": w_hh,
        "b": b_ih + b_hh, "w_tag": w_tag, "b_tag": b_tag,
    }


def pos_lstm_reference(sentences, params):
    """Pure-JAX forward mirroring the kernel's bf16-operand / f32-math split."""
    meta = params["meta"]
    V, H = meta["V"], meta["H"]
    emb_proj = (params["emb"] @ params["w_ih"]).astype(jnp.bfloat16)
    w_hh = params["w_hh"].astype(jnp.bfloat16)
    w_tag = params["w_tag"].astype(jnp.bfloat16)
    b = params["b"]
    b_tag = params["b_tag"]
    outs = []
    for n in range(sentences.shape[0]):
        sent = sentences[n]
        onehot = jax.nn.one_hot(sent, V, dtype=jnp.bfloat16)
        x_proj = jnp.dot(onehot, emb_proj,
                         preferred_element_type=jnp.float32) + b
        h = jnp.zeros((1, H), jnp.float32)
        c = jnp.zeros((1, H), jnp.float32)
        rows = []
        for t in range(sent.shape[0]):
            gates = x_proj[t:t + 1, :] + jnp.dot(
                h.astype(jnp.bfloat16), w_hh, preferred_element_type=jnp.float32)
            i_g = jax.nn.sigmoid(gates[:, 0:H])
            f_g = jax.nn.sigmoid(gates[:, H:2 * H])
            g_g = jnp.tanh(gates[:, 2 * H:3 * H])
            o_g = jax.nn.sigmoid(gates[:, 3 * H:4 * H])
            c = f_g * c + i_g * g_g
            h = o_g * jnp.tanh(c)
            rows.append(jnp.dot(h.astype(jnp.bfloat16), w_tag,
                                preferred_element_type=jnp.float32) + b_tag)
        outs.append(jnp.concatenate(rows, axis=0))
    return jnp.stack(outs, axis=0)


if __name__ == "__main__":
    # Small shapes consistent with the module: seq_len=8, embedding_dim=16,
    # hidden_dim=32, vocab_size=32, target_size=8; N=4 independent sentences
    # (each sentence still has LSTM batch=1 and zero-initialized hidden,
    # matching the torch module called once per sentence).
    seq_len, embedding_dim, hidden_dim = 8, 16, 32
    vocab_size, target_size, num_sentences = 32, 8, 4

    key = jax.random.PRNGKey(0)
    k_params, k_sent = jax.random.split(key)
    params = init_params(k_params, vocab_size, embedding_dim, hidden_dim,
                         target_size)
    sentences = jax.random.randint(k_sent, (num_sentences, seq_len), 0,
                                   vocab_size, jnp.int32)

    tag_space = pos_lstm_forward(sentences, params)
    jax.block_until_ready(tag_space)
    assert tag_space.shape == (num_sentences, seq_len, target_size)
    assert bool(jnp.all(jnp.isfinite(tag_space)))

    ref = pos_lstm_reference(sentences, params)
    assert bool(jnp.allclose(tag_space, ref, rtol=2e-2, atol=2e-2))
    print("KERNEL_OK")
</pallas_src>

<mosaic_0001>
module attributes {stable_mosaic.version = 11 : i64} {
  func.func @_pos_lstm_kernel(%arg0: i32, %arg1: memref<1x8x1xi32, #tpu.memory_space<vmem>>, %arg2: memref<96x128xbf16, #tpu.memory_space<vmem>>, %arg3: memref<2x128xf32, #tpu.memory_space<vmem>>, %arg4: memref<1x8x128xf32, #tpu.memory_space<vmem>>) attributes {dimension_semantics = [#tpu.dimension_semantics<parallel>], iteration_bounds = array<i64: 4>, scalar_prefetch = 0 : i64, scratch_operands = 0 : i64, tpu.core_type = #tpu.core_type<tc>, window_params = [{transform_indices = @transform_0, window_bounds = array<i64: 1, 8, 1>}, {pipeline_mode = #tpu.pipeline_mode<synchronous>, transform_indices = @transform_1, window_bounds = array<i64: 96, 128>}, {pipeline_mode = #tpu.pipeline_mode<synchronous>, transform_indices = @transform_2, window_bounds = array<i64: 2, 128>}, {transform_indices = @transform_3, window_bounds = array<i64: 1, 8, 128>}]} {
    %c0 = arith.constant 0 : index
    %c0_0 = arith.constant 0 : index
    %c0_1 = arith.constant 0 : index
    %0 = vector.load %arg1[%c0, %c0_0, %c0_1] : memref<1x8x1xi32, #tpu.memory_space<vmem>>, vector<1x8x1xi32>
    %1 = vector.shape_cast %0 : vector<1x8x1xi32> to vector<8x1xi32>
    %2 = tpu.iota {dimensions = array<i32: 1>} : vector<8x32xi32>
    %3 = vector.broadcast %1 : vector<8x1xi32> to vector<8x32xi32>
    %4 = arith.cmpi eq, %3, %2 : vector<8x32xi32>
    %5 = arith.extui %4 : vector<8x32xi1> to vector<8x32xi32>
    %6 = arith.sitofp %5 : vector<8x32xi32> to vector<8x32xf32>
    %7 = arith.truncf %6 : vector<8x32xf32> to vector<8x32xbf16>
    %c0_2 = arith.constant 0 : index
    %c0_3 = arith.constant 0 : index
    %8 = vector.load %arg2[%c0_2, %c0_3] : memref<96x128xbf16, #tpu.memory_space<vmem>>, vector<32x128xbf16>
    %cst = arith.constant dense<0.000000e+00> : vector<8x128xf32>
    %9 = tpu.matmul %7, %8, %cst {dimension_numbers = #tpu.dot_dimension_numbers<[1], [0], [0], [1], [0, 0, 1, 1], [], []>} : vector<8x32xbf16>, vector<32x128xbf16>, vector<8x128xf32> -> vector<8x128xf32>
    %c0_4 = arith.constant 0 : index
    %c0_5 = arith.constant 0 : index
    %10 = vector.load %arg3[%c0_4, %c0_5] : memref<2x128xf32, #tpu.memory_space<vmem>>, vector<1x128xf32>
    %11 = vector.broadcast %10 : vector<1x128xf32> to vector<8x128xf32>
    %12 = arith.addf %9, %11 : vector<8x128xf32>
    %c32 = arith.constant 32 : index
    %c0_6 = arith.constant 0 : index
    %13 = vector.load %arg2[%c32, %c0_6] : memref<96x128xbf16, #tpu.memory_space<vmem>>, vector<32x128xbf16>
    %c64 = arith.constant 64 : index
    %c0_7 = arith.constant 0 : index
    %14 = vector.load %arg2[%c64, %c0_7] : memref<96x128xbf16, #tpu.memory_space<vmem>>, vector<32x128xbf16>
    %c1 = arith.constant 1 : index
    %c0_8 = arith.constant 0 : index
    %15 = vector.load %arg3[%c1, %c0_8] : memref<2x128xf32, #tpu.memory_space<vmem>>, vector<1x128xf32>
    %cst_9 = arith.constant 0.000000e+00 : f32
    %16 = vector.broadcast %cst_9 : f32 to vector<1x32xf32>
    %cst_10 = arith.constant 0.000000e+00 : f32
    %17 = vector.broadcast %cst_10 : f32 to vector<1x32xf32>
    %18 = arith.truncf %16 : vector<1x32xf32> to vector<1x32xbf16>
    %19 = vector.extract_strided_slice %12 {offsets = [0, 0], sizes = [1, 128], strides = [1, 1]} : vector<8x128xf32> to vector<1x128xf32>
    %cst_11 = arith.constant dense<0.000000e+00> : vector<1x128xf32>
    %20 = tpu.matmul %18, %13, %cst_11 {dimension_numbers = #tpu.dot_dimension_numbers<[1], [0], [0], [1], [0, 0, 1, 1], [], []>} : vector<1x32xbf16>, vector<32x128xbf16>, vector<1x128xf32> -> vector<1x128xf32>
    %21 = arith.addf %19, %20 : vector<1x128xf32>
    %22 = arith.negf %21 : vector<1x128xf32>
    %23 = math.exp %22 : vector<1x128xf32>
    %cst_12 = arith.constant 1.000000e+00 : f32
    %24 = vector.broadcast %cst_12 : f32 to vector<1x128xf32>
    %25 = arith.addf %24, %23 : vector<1x128xf32>
    %26 = arith.divf %24, %25 : vector<1x128xf32>
    %27 = math.tanh %21 : vector<1x128xf32>
    %28 = vector.extract_strided_slice %26 {offsets = [0, 0], sizes = [1, 32], strides = [1, 1]} : vector<1x128xf32> to vector<1x32xf32>
    %29 = vector.extract_strided_slice %26 {offsets = [0, 32], sizes = [1, 32], strides = [1, 1]} : vector<1x128xf32> to vector<1x32xf32>
    %30 = vector.extract_strided_slice %27 {offsets = [0, 64], sizes = [1, 32], strides = [1, 1]} : vector<1x128xf32> to vector<1x32xf32>
    %31 = vector.extract_strided_slice %26 {offsets = [0, 96], sizes = [1, 32], strides = [1, 1]} : vector<1x128xf32> to vector<1x32xf32>
    %32 = arith.mulf %29, %17 : vector<1x32xf32>
    %33 = arith.mulf %28, %30 : vector<1x32xf32>
    %34 = arith.addf %32, %33 : vector<1x32xf32>
    %35 = math.tanh %34 : vector<1x32xf32>
    %36 = arith.mulf %31, %35 : vector<1x32xf32>
    %37 = arith.truncf %36 : vector<1x32xf32> to vector<1x32xbf16>
    %cst_13 = arith.constant dense<0.000000e+00> : vector<1x128xf32>
    %38 = tpu.matmul %37, %14, %cst_13 {dimension_numbers = #tpu.dot_dimension_numbers<[1], [0], [0], [1], [0, 0, 1, 1], [], []>} : vector<1x32xbf16>, vector<32x128xbf16>, vector<1x128xf32> -> vector<1x128xf32>
    %39 = arith.addf %38, %15 : vector<1x128xf32>
    %c0_14 = arith.constant 0 : index
    %c0_15 = arith.constant 0 : index
    %c0_16 = arith.constant 0 : index
    %40 = vector.load %arg4[%c0_14, %c0_15, %c0_16] : memref<1x8x128xf32, #tpu.memory_space<vmem>>, vector<1x1x128xf32>
    %41 = vector.shape_cast %40 : vector<1x1x128xf32> to vector<1x128xf32>
    %42 = vector.shape_cast %39 : vector<1x128xf32> to vector<1x1x128xf32>
    tpu.vector_store %arg4[%c0_14, %c0_15, %c0_16], %42 {strides = array<i32>} : memref<1x8x128xf32, #tpu.memory_space<vmem>>, vector<1x1x128xf32>,
    %43 = vector.extract_strided_slice %12 {offsets = [1, 0], sizes = [1, 128], strides = [1, 1]} : vector<8x128xf32> to vector<1x128xf32>
    %cst_17 = arith.constant dense<0.000000e+00> : vector<1x128xf32>
    %44 = tpu.matmul %37, %13, %cst_17 {dimension_numbers = #tpu.dot_dimension_numbers<[1], [0], [0], [1], [0, 0, 1, 1], [], []>} : vector<1x32xbf16>, vector<32x128xbf16>, vector<1x128xf32> -> vector<1x128xf32>
    %45 = arith.addf %43, %44 : vector<1x128xf32>
    %46 = arith.negf %45 : vector<1x128xf32>
    %47 = math.exp %46 : vector<1x128xf32>
    %cst_18 = arith.constant 1.000000e+00 : f32
    %48 = vector.broadcast %cst_18 : f32 to vector<1x128xf32>
    %49 = arith.addf %48, %47 : vector<1x128xf32>
    %50 = arith.divf %48, %49 : vector<1x128xf32>
    %51 = math.tanh %45 : vector<1x128xf32>
    %52 = vector.extract_strided_slice %50 {offsets = [0, 0], sizes = [1, 32], strides = [1, 1]} : vector<1x128xf32> to vector<1x32xf32>
    %53 = vector.extract_strided_slice %50 {offsets = [0, 32], sizes = [1, 32], strides = [1, 1]} : vector<1x128xf32> to vector<1x32xf32>
    %54 = vector.extract_strided_slice %51 {offsets = [0, 64], sizes = [1, 32], strides = [1, 1]} : vector<1x128xf32> to vector<1x32xf32>
    %55 = vector.extract_strided_slice %50 {offsets = [0, 96], sizes = [1, 32], strides = [1, 1]} : vector<1x128xf32> to vector<1x32xf32>
    %56 = arith.mulf %53, %34 : vector<1x32xf32>
    %57 = arith.mulf %52, %54 : vector<1x32xf32>
    %58 = arith.addf %56, %57 : vector<1x32xf32>
    %59 = math.tanh %58 : vector<1x32xf32>
    %60 = arith.mulf %55, %59 : vector<1x32xf32>
    %61 = arith.truncf %60 : vector<1x32xf32> to vector<1x32xbf16>
    %cst_19 = arith.constant dense<0.000000e+00> : vector<1x128xf32>
    %62 = tpu.matmul %61, %14, %cst_19 {dimension_numbers = #tpu.dot_dimension_numbers<[1], [0], [0], [1], [0, 0, 1, 1], [], []>} : vector<1x32xbf16>, vector<32x128xbf16>, vector<1x128xf32> -> vector<1x128xf32>
    %63 = arith.addf %62, %15 : vector<1x128xf32>
    %c0_20 = arith.constant 0 : index
    %c1_21 = arith.constant 1 : index
    %c0_22 = arith.constant 0 : index
    %64 = vector.load %arg4[%c0_20, %c1_21, %c0_22] : memref<1x8x128xf32, #tpu.memory_space<vmem>>, vector<1x1x128xf32>
    %65 = vector.shape_cast %64 : vector<1x1x128xf32> to vector<1x128xf32>
    %66 = vector.shape_cast %63 : vector<1x128xf32> to vector<1x1x128xf32>
    tpu.vector_store %arg4[%c0_20, %c1_21, %c0_22], %66 {strides = array<i32>} : memref<1x8x128xf32, #tpu.memory_space<vmem>>, vector<1x1x128xf32>,
    %67 = vector.extract_strided_slice %12 {offsets = [2, 0], sizes = [1, 128], strides = [1, 1]} : vector<8x128xf32> to vector<1x128xf32>
    %cst_23 = arith.constant dense<0.000000e+00> : vector<1x128xf32>
    %68 = tpu.matmul %61, %13, %cst_23 {dimension_numbers = #tpu.dot_dimension_numbers<[1], [0], [0], [1], [0, 0, 1, 1], [], []>} : vector<1x32xbf16>, vector<32x128xbf16>, vector<1x128xf32> -> vector<1x128xf32>
    %69 = arith.addf %67, %68 : vector<1x128xf32>
    %70 = arith.negf %69 : vector<1x128xf32>
    %71 = math.exp %70 : vector<1x128xf32>
    %cst_24 = arith.constant 1.000000e+00 : f32
    %72 = vector.broadcast %cst_24 : f32 to vector<1x128xf32>
    %73 = arith.addf %72, %71 : vector<1x128xf32>
    %74 = arith.divf %72, %73 : vector<1x128xf32>
    %75 = math.tanh %69 : vector<1x128xf32>
    %76 = vector.extract_strided_slice %74 {offsets = [0, 0], sizes = [1, 32], strides = [1, 1]} : vector<1x128xf32> to vector<1x32xf32>
    %77 = vector.extract_strided_slice %74 {offsets = [0, 32], sizes = [1, 32], strides = [1, 1]} : vector<1x128xf32> to vector<1x32xf32>
    %78 = vector.extract_strided_slice %75 {offsets = [0, 64], sizes = [1, 32], strides = [1, 1]} : vector<1x128xf32> to vector<1x32xf32>
    %79 = vector.extract_strided_slice %74 {offsets = [0, 96], sizes = [1, 32], strides = [1, 1]} : vector<1x128xf32> to vector<1x32xf32>
    %80 = arith.mulf %77, %58 : vector<1x32xf32>
    %81 = arith.mulf %76, %78 : vector<1x32xf32>
    %82 = arith.addf %80, %81 : vector<1x32xf32>
    %83 = math.tanh %82 : vector<1x32xf32>
    %84 = arith.mulf %79, %83 : vector<1x32xf32>
    %85 = arith.truncf %84 : vector<1x32xf32> to vector<1x32xbf16>
    %cst_25 = arith.constant dense<0.000000e+00> : vector<1x128xf32>
    %86 = tpu.matmul %85, %14, %cst_25 {dimension_numbers = #tpu.dot_dimension_numbers<[1], [0], [0], [1], [0, 0, 1, 1], [], []>} : vector<1x32xbf16>, vector<32x128xbf16>, vector<1x128xf32> -> vector<1x128xf32>
    %87 = arith.addf %86, %15 : vector<1x128xf32>
    %c0_26 = arith.constant 0 : index
    %c2 = arith.constant 2 : index
    %c0_27 = arith.constant 0 : index
    %88 = vector.load %arg4[%c0_26, %c2, %c0_27] : memref<1x8x128xf32, #tpu.memory_space<vmem>>, vector<1x1x128xf32>
    %89 = vector.shape_cast %88 : vector<1x1x128xf32> to vector<1x128xf32>
    %90 = vector.shape_cast %87 : vector<1x128xf32> to vector<1x1x128xf32>
    tpu.vector_store %arg4[%c0_26, %c2, %c0_27], %90 {strides = array<i32>} : memref<1x8x128xf32, #tpu.memory_space<vmem>>, vector<1x1x128xf32>,
    %91 = vector.extract_strided_slice %12 {offsets = [3, 0], sizes = [1, 128], strides = [1, 1]} : vector<8x128xf32> to vector<1x128xf32>
    %cst_28 = arith.constant dense<0.000000e+00> : vector<1x128xf32>
    %92 = tpu.matmul %85, %13, %cst_28 {dimension_numbers = #tpu.dot_dimension_numbers<[1], [0], [0], [1], [0, 0, 1, 1], [], []>} : vector<1x32xbf16>, vector<32x128xbf16>, vector<1x128xf32> -> vector<1x128xf32>
    %93 = arith.addf %91, %92 : vector<1x128xf32>
    %94 = arith.negf %93 : vector<1x128xf32>
    %95 = math.exp %94 : vector<1x128xf32>
    %cst_29 = arith.constant 1.000000e+00 : f32
    %96 = vector.broadcast %cst_29 : f32 to vector<1x128xf32>
    %97 = arith.addf %96, %95 : vector<1x128xf32>
    %98 = arith.divf %96, %97 : vector<1x128xf32>
    %99 = math.tanh %93 : vector<1x128xf32>
    %100 = vector.extract_strided_slice %98 {offsets = [0, 0], sizes = [1, 32], strides = [1, 1]} : vector<1x128xf32> to vector<1x32xf32>
    %101 = vector.extract_strided_slice %98 {offsets = [0, 32], sizes = [1, 32], strides = [1, 1]} : vector<1x128xf32> to vector<1x32xf32>
    %102 = vector.extract_strided_slice %99 {offsets = [0, 64], sizes = [1, 32], strides = [1, 1]} : vector<1x128xf32> to vector<1x32xf32>
    %103 = vector.extract_strided_slice %98 {offsets = [0, 96], sizes = [1, 32], strides = [1, 1]} : vector<1x128xf32> to vector<1x32xf32>
    %104 = arith.mulf %101, %82 : vector<1x32xf32>
    %105 = arith.mulf %100, %102 : vector<1x32xf32>
    %106 = arith.addf %104, %105 : vector<1x32xf32>
    %107 = math.tanh %106 : vector<1x32xf32>
    %108 = arith.mulf %103, %107 : vector<1x32xf32>
    %109 = arith.truncf %108 : vector<1x32xf32> to vector<1x32xbf16>
    %cst_30 = arith.constant dense<0.000000e+00> : vector<1x128xf32>
    %110 = tpu.matmul %109, %14, %cst_30 {dimension_numbers = #tpu.dot_dimension_numbers<[1], [0], [0], [1], [0, 0, 1, 1], [], []>} : vector<1x32xbf16>, vector<32x128xbf16>, vector<1x128xf32> -> vector<1x128xf32>
    %111 = arith.addf %110, %15 : vector<1x128xf32>
    %c0_31 = arith.constant 0 : index
    %c3 = arith.constant 3 : index
    %c0_32 = arith.constant 0 : index
    %112 = vector.load %arg4[%c0_31, %c3, %c0_32] : memref<1x8x128xf32, #tpu.memory_space<vmem>>, vector<1x1x128xf32>
    %113 = vector.shape_cast %112 : vector<1x1x128xf32> to vector<1x128xf32>
    %114 = vector.shape_cast %111 : vector<1x128xf32> to vector<1x1x128xf32>
    tpu.vector_store %arg4[%c0_31, %c3, %c0_32], %114 {strides = array<i32>} : memref<1x8x128xf32, #tpu.memory_space<vmem>>, vector<1x1x128xf32>,
    %115 = vector.extract_strided_slice %12 {offsets = [4, 0], sizes = [1, 128], strides = [1, 1]} : vector<8x128xf32> to vector<1x128xf32>
    %cst_33 = arith.constant dense<0.000000e+00> : vector<1x128xf32>
    %116 = tpu.matmul %109, %13, %cst_33 {dimension_numbers = #tpu.dot_dimension_numbers<[1], [0], [0], [1], [0, 0, 1, 1], [], []>} : vector<1x32xbf16>, vector<32x128xbf16>, vector<1x128xf32> -> vector<1x128xf32>
    %117 = arith.addf %115, %116 : vector<1x128xf32>
    %118 = arith.negf %117 : vector<1x128xf32>
    %119 = math.exp %118 : vector<1x128xf32>
    %cst_34 = arith.constant 1.000000e+00 : f32
    %120 = vector.broadcast %cst_34 : f32 to vector<1x128xf32>
    %121 = arith.addf %120, %119 : vector<1x128xf32>
    %122 = arith.divf %120, %121 : vector<1x128xf32>
    %123 = math.tanh %117 : vector<1x128xf32>
    %124 = vector.extract_strided_slice %122 {offsets = [0, 0], sizes = [1, 32], strides = [1, 1]} : vector<1x128xf32> to vector<1x32xf32>
    %125 = vector.extract_strided_slice %122 {offsets = [0, 32], sizes = [1, 32], strides = [1, 1]} : vector<1x128xf32> to vector<1x32xf32>
    %126 = vector.extract_strided_slice %123 {offsets = [0, 64], sizes = [1, 32], strides = [1, 1]} : vector<1x128xf32> to vector<1x32xf32>
    %127 = vector.extract_strided_slice %122 {offsets = [0, 96], sizes = [1, 32], strides = [1, 1]} : vector<1x128xf32> to vector<1x32xf32>
    %128 = arith.mulf %125, %106 : vector<1x32xf32>
    %129 = arith.mulf %124, %126 : vector<1x32xf32>
    %130 = arith.addf %128, %129 : vector<1x32xf32>
    %131 = math.tanh %130 : vector<1x32xf32>
    %132 = arith.mulf %127, %131 : vector<1x32xf32>
    %133 = arith.truncf %132 : vector<1x32xf32> to vector<1x32xbf16>
    %cst_35 = arith.constant dense<0.000000e+00> : vector<1x128xf32>
    %134 = tpu.matmul %133, %14, %cst_35 {dimension_numbers = #tpu.dot_dimension_numbers<[1], [0], [0], [1], [0, 0, 1, 1], [], []>} : vector<1x32xbf16>, vector<32x128xbf16>, vector<1x128xf32> -> vector<1x128xf32>
    %135 = arith.addf %134, %15 : vector<1x128xf32>
    %c0_36 = arith.constant 0 : index
    %c4 = arith.constant 4 : index
    %c0_37 = arith.constant 0 : index
    %136 = vector.load %arg4[%c0_36, %c4, %c0_37] : memref<1x8x128xf32, #tpu.memory_space<vmem>>, vector<1x1x128xf32>
    %137 = vector.shape_cast %136 : vector<1x1x128xf32> to vector<1x128xf32>
    %138 = vector.shape_cast %135 : vector<1x128xf32> to vector<1x1x128xf32>
    tpu.vector_store %arg4[%c0_36, %c4, %c0_37], %138 {strides = array<i32>} : memref<1x8x128xf32, #tpu.memory_space<vmem>>, vector<1x1x128xf32>,
    %139 = vector.extract_strided_slice %12 {offsets = [5, 0], sizes = [1, 128], strides = [1, 1]} : vector<8x128xf32> to vector<1x128xf32>
    %cst_38 = arith.constant dense<0.000000e+00> : vector<1x128xf32>
    %140 = tpu.matmul %133, %13, %cst_38 {dimension_numbers = #tpu.dot_dimension_numbers<[1], [0], [0], [1], [0, 0, 1, 1], [], []>} : vector<1x32xbf16>, vector<32x128xbf16>, vector<1x128xf32> -> vector<1x128xf32>
    %141 = arith.addf %139, %140 : vector<1x128xf32>
    %142 = arith.negf %141 : vector<1x128xf32>
    %143 = math.exp %142 : vector<1x128xf32>
    %cst_39 = arith.constant 1.000000e+00 : f32
    %144 = vector.broadcast %cst_39 : f32 to vector<1x128xf32>
    %145 = arith.addf %144, %143 : vector<1x128xf32>
    %146 = arith.divf %144, %145 : vector<1x128xf32>
    %147 = math.tanh %141 : vector<1x128xf32>
    %148 = vector.extract_strided_slice %146 {offsets = [0, 0], sizes = [1, 32], strides = [1, 1]} : vector<1x128xf32> to vector<1x32xf32>
    %149 = vector.extract_strided_slice %146 {offsets = [0, 32], sizes = [1, 32], strides = [1, 1]} : vector<1x128xf32> to vector<1x32xf32>
    %150 = vector.extract_strided_slice %147 {offsets = [0, 64], sizes = [1, 32], strides = [1, 1]} : vector<1x128xf32> to vector<1x32xf32>
    %151 = vector.extract_strided_slice %146 {offsets = [0, 96], sizes = [1, 32], strides = [1, 1]} : vector<1x128xf32> to vector<1x32xf32>
    %152 = arith.mulf %149, %130 : vector<1x32xf32>
    %153 = arith.mulf %148, %150 : vector<1x32xf32>
    %154 = arith.addf %152, %153 : vector<1x32xf32>
    %155 = math.tanh %154 : vector<1x32xf32>
    %156 = arith.mulf %151, %155 : vector<1x32xf32>
    %157 = arith.truncf %156 : vector<1x32xf32> to vector<1x32xbf16>
    %cst_40 = arith.constant dense<0.000000e+00> : vector<1x128xf32>
    %158 = tpu.matmul %157, %14, %cst_40 {dimension_numbers = #tpu.dot_dimension_numbers<[1], [0], [0], [1], [0, 0, 1, 1], [], []>} : vector<1x32xbf16>, vector<32x128xbf16>, vector<1x128xf32> -> vector<1x128xf32>
    %159 = arith.addf %158, %15 : vector<1x128xf32>
    %c0_41 = arith.constant 0 : index
    %c5 = arith.constant 5 : index
    %c0_42 = arith.constant 0 : index
    %160 = vector.load %arg4[%c0_41, %c5, %c0_42] : memref<1x8x128xf32, #tpu.memory_space<vmem>>, vector<1x1x128xf32>
    %161 = vector.shape_cast %160 : vector<1x1x128xf32> to vector<1x128xf32>
    %162 = vector.shape_cast %159 : vector<1x128xf32> to vector<1x1x128xf32>
    tpu.vector_store %arg4[%c0_41, %c5, %c0_42], %162 {strides = array<i32>} : memref<1x8x128xf32, #tpu.memory_space<vmem>>, vector<1x1x128xf32>,
    %163 = vector.extract_strided_slice %12 {offsets = [6, 0], sizes = [1, 128], strides = [1, 1]} : vector<8x128xf32> to vector<1x128xf32>
    %cst_43 = arith.constant dense<0.000000e+00> : vector<1x128xf32>
    %164 = tpu.matmul %157, %13, %cst_43 {dimension_numbers = #tpu.dot_dimension_numbers<[1], [0], [0], [1], [0, 0, 1, 1], [], []>} : vector<1x32xbf16>, vector<32x128xbf16>, vector<1x128xf32> -> vector<1x128xf32>
    %165 = arith.addf %163, %164 : vector<1x128xf32>
    %166 = arith.negf %165 : vector<1x128xf32>
    %167 = math.exp %166 : vector<1x128xf32>
    %cst_44 = arith.constant 1.000000e+00 : f32
    %168 = vector.broadcast %cst_44 : f32 to vector<1x128xf32>
    %169 = arith.addf %168, %167 : vector<1x128xf32>
    %170 = arith.divf %168, %169 : vector<1x128xf32>
    %171 = math.tanh %165 : vector<1x128xf32>
    %172 = vector.extract_strided_slice %170 {offsets = [0, 0], sizes = [1, 32], strides = [1, 1]} : vector<1x128xf32> to vector<1x32xf32>
    %173 = vector.extract_strided_slice %170 {offsets = [0, 32], sizes = [1, 32], strides = [1, 1]} : vector<1x128xf32> to vector<1x32xf32>
    %174 = vector.extract_strided_slice %171 {offsets = [0, 64], sizes = [1, 32], strides = [1, 1]} : vector<1x128xf32> to vector<1x32xf32>
    %175 = vector.extract_strided_slice %170 {offsets = [0, 96], sizes = [1, 32], strides = [1, 1]} : vector<1x128xf32> to vector<1x32xf32>
    %176 = arith.mulf %173, %154 : vector<1x32xf32>
    %177 = arith.mulf %172, %174 : vector<1x32xf32>
    %178 = arith.addf %176, %177 : vector<1x32xf32>
    %179 = math.tanh %178 : vector<1x32xf32>
    %180 = arith.mulf %175, %179 : vector<1x32xf32>
    %181 = arith.truncf %180 : vector<1x32xf32> to vector<1x32xbf16>
    %cst_45 = arith.constant dense<0.000000e+00> : vector<1x128xf32>
    %182 = tpu.matmul %181, %14, %cst_45 {dimension_numbers = #tpu.dot_dimension_numbers<[1], [0], [0], [1], [0, 0, 1, 1], [], []>} : vector<1x32xbf16>, vector<32x128xbf16>, vector<1x128xf32> -> vector<1x128xf32>
    %183 = arith.addf %182, %15 : vector<1x128xf32>
    %c0_46 = arith.constant 0 : index
    %c6 = arith.constant 6 : index
    %c0_47 = arith.constant 0 : index
    %184 = vector.load %arg4[%c0_46, %c6, %c0_47] : memref<1x8x128xf32, #tpu.memory_space<vmem>>, vector<1x1x128xf32>
    %185 = vector.shape_cast %184 : vector<1x1x128xf32> to vector<1x128xf32>
    %186 = vector.shape_cast %183 : vector<1x128xf32> to vector<1x1x128xf32>
    tpu.vector_store %arg4[%c0_46, %c6, %c0_47], %186 {strides = array<i32>} : memref<1x8x128xf32, #tpu.memory_space<vmem>>, vector<1x1x128xf32>,
    %187 = vector.extract_strided_slice %12 {offsets = [7, 0], sizes = [1, 128], strides = [1, 1]} : vector<8x128xf32> to vector<1x128xf32>
    %cst_48 = arith.constant dense<0.000000e+00> : vector<1x128xf32>
    %188 = tpu.matmul %181, %13, %cst_48 {dimension_numbers = #tpu.dot_dimension_numbers<[1], [0], [0], [1], [0, 0, 1, 1], [], []>} : vector<1x32xbf16>, vector<32x128xbf16>, vector<1x128xf32> -> vector<1x128xf32>
    %189 = arith.addf %187, %188 : vector<1x128xf32>
    %190 = arith.negf %189 : vector<1x128xf32>
    %191 = math.exp %190 : vector<1x128xf32>
    %cst_49 = arith.constant 1.000000e+00 : f32
    %192 = vector.broadcast %cst_49 : f32 to vector<1x128xf32>
    %193 = arith.addf %192, %191 : vector<1x128xf32>
    %194 = arith.divf %192, %193 : vector<1x128xf32>
    %195 = math.tanh %189 : vector<1x128xf32>
    %196 = vector.extract_strided_slice %194 {offsets = [0, 0], sizes = [1, 32], strides = [1, 1]} : vector<1x128xf32> to vector<1x32xf32>
    %197 = vector.extract_strided_slice %194 {offsets = [0, 32], sizes = [1, 32], strides = [1, 1]} : vector<1x128xf32> to vector<1x32xf32>
    %198 = vector.extract_strided_slice %195 {offsets = [0, 64], sizes = [1, 32], strides = [1, 1]} : vector<1x128xf32> to vector<1x32xf32>
    %199 = vector.extract_strided_slice %194 {offsets = [0, 96], sizes = [1, 32], strides = [1, 1]} : vector<1x128xf32> to vector<1x32xf32>
    %200 = arith.mulf %197, %178 : vector<1x32xf32>
    %201 = arith.mulf %196, %198 : vector<1x32xf32>
    %202 = arith.addf %200, %201 : vector<1x32xf32>
    %203 = math.tanh %202 : vector<1x32xf32>
    %204 = arith.mulf %199, %203 : vector<1x32xf32>
    %205 = arith.truncf %204 : vector<1x32xf32> to vector<1x32xbf16>
    %cst_50 = arith.constant dense<0.000000e+00> : vector<1x128xf32>
    %206 = tpu.matmul %205, %14, %cst_50 {dimension_numbers = #tpu.dot_dimension_numbers<[1], [0], [0], [1], [0, 0, 1, 1], [], []>} : vector<1x32xbf16>, vector<32x128xbf16>, vector<1x128xf32> -> vector<1x128xf32>
    %207 = arith.addf %206, %15 : vector<1x128xf32>
    %c0_51 = arith.constant 0 : index
    %c7 = arith.constant 7 : index
    %c0_52 = arith.constant 0 : index
    %208 = vector.load %arg4[%c0_51, %c7, %c0_52] : memref<1x8x128xf32, #tpu.memory_space<vmem>>, vector<1x1x128xf32>
    %209 = vector.shape_cast %208 : vector<1x1x128xf32> to vector<1x128xf32>
    %210 = vector.shape_cast %207 : vector<1x128xf32> to vector<1x1x128xf32>
    tpu.vector_store %arg4[%c0_51, %c7, %c0_52], %210 {strides = array<i32>} : memref<1x8x128xf32, #tpu.memory_space<vmem>>, vector<1x1x128xf32>,
    return
  }
  func.func @transform_0(%arg0: i32) -> (i32, i32, i32) {
    %c0_i32 = arith.constant 0 : i32
    %c0_i32_0 = arith.constant 0 : i32
    %c0_i32_1 = arith.constant 0 : i32
    return %arg0, %c0_i32, %c0_i32_0 : i32, i32, i32
  }
  func.func @transform_1(%arg0: i32) -> (i32, i32) {
    %c0_i32 = arith.constant 0 : i32
    %c0_i32_0 = arith.constant 0 : i32
    %c0_i32_1 = arith.constant 0 : i32
    return %c0_i32, %c0_i32_0 : i32, i32
  }
  func.func @transform_2(%arg0: i32) -> (i32, i32) {
    %c0_i32 = arith.constant 0 : i32
    %c0_i32_0 = arith.constant 0 : i32
    %c0_i32_1 = arith.constant 0 : i32
    return %c0_i32, %c0_i32_0 : i32, i32
  }
  func.func @transform_3(%arg0: i32) -> (i32, i32, i32) {
    %c0_i32 = arith.constant 0 : i32
    %c0_i32_0 = arith.constant 0 : i32
    %c0_i32_1 = arith.constant 0 : i32
    return %arg0, %c0_i32, %c0_i32_0 : i32, i32, i32
  }
}

</mosaic_0001>

<bundles_post_ra>
// kernel: tpu_custom_call.1
= control target key start
LH: loop header
LB: loop body
LE: loop exit
PB: predicated region body
PF: predicated region fallthrough
CT: control target
= control target key end

     0   :  { %8 = vsyncpa [#allocation3], 0  ;;  %s2133_s0 = inlined_call_operand.vmem [shape: s32[4,8,1], index: 0, kind: input, shape index: {}]   ;;  %s2134_s1 = inlined_call_operand.hbm [shape: bf16[96,128], index: 1, kind: input, shape index: {}]   ;;  %s2135_s2 = inlined_call_operand.vmem [shape: f32[2,128], index: 2, kind: input, shape index: {}]   ;;  %s2136_s3 = inlined_call_operand.hbm [shape: f32[4,8,128], index: 3, kind: output, shape index: {}]  }
   0x1   :  { %9 = vsyncpa [#allocation4], 0 }
   0x2   :  { %11 = vsyncpa [#allocation4 + $0x1], 0  ;;  %s1818_s12 = smov 0   ;;  %s1820_s13 = smov 0  }
   0x3   :  { %s1822_s14 = smov 0   ;;  %s1824_s15 = smov 0  }
   0x4 LB: > { %s1839_s16 = sadd.s32 4294967295, %s1787_s15   ;;  %s1338_s17 = sadd.s32 4294967294, %s1787_s15   ;;  %s1787_s15 = sphi %s1824_s15, %s2144_s15   ;;  %s1783_s14 = sphi %s1822_s14, %s2143_s14   ;;  %s1779_s13 = sphi %s1820_s13, %s2142_s13   ;;  %s1775_s12 = sphi %s1818_s12, %s2141_s12  }
   0x5   : > { %s1843_s18 = sadd.s32 1, %s1787_s15   ;;  %s92_s19 = sadd.s32 1, %s1783_s14 }
   0x6   : > { %s89_s20 = ssub.s32 %s1787_s15, %s1843_s18  ;;  %p102_p0 = scmp.ne.s32.totalorder %s1783_s14, %s1779_s13 }
   0x7   : > { %p90_p1 = scmp.eq.s32.totalorder %s89_s20, 0  ;;  %p103_p2 = scmp.eq.s32.totalorder %s1839_s16, 3 }
   0x8   : > { %p108_p3 = scmp.ne.s32.totalorder %s1779_s13, %s1775_s12  ;;  %p109_p4 = scmp.eq.s32.totalorder %s1338_s17, 3 }
   0x9   : > { %s1854_s21 = scalar_select %p90_p1, %s1783_s14, %s92_s19  }
   0xa   : > { %p1856_p5 = por %p103_p2, %p102_p0  ;;  %p1860_p6 = por %p109_p4, %p108_p3 }
   0xb   : > { %p1339_p7 = scmp.ge.s32.totalorder %s1787_s15, 1  ;;  %p116_p8 = scmp.lt.s32.totalorder %s1787_s15, 5 }
   0xc   : > { %s2138_s23 = scalar_select %p1860_p6, 1, 0 }
   0xd   : > { %p1583_p9 = scmp.eq.s32.totalorder %s1839_s16, 0  ;;  %p1867_p10 = pnand %p1339_p7, %p116_p8 }
   0xe   : > { %s1789_s25 = smov [#allocation2]  }
   0xf   : > { %s128_s26 = sshll.u32 %s1789_s25, 4  ;;  %p1575_p11 = pneg %p1867_p10  ;;  %s129_s26 = int_to_ptr.vmem [resolvable:$true] %s128_s26 }
  0x10   : > { %s1708_s27 = scalar_lea.vmem %s129_s26, 768  ;;  %p1716_p3 = scmp.lt.s32.totalorder %s129_s26, %s129_s26 }
  0x11   : > { %p1576_p12 = pnand %p1583_p9, %p1575_p11  ;;  %p1709_p0 = scmp.ne.s32.totalorder %s129_s26, %s1708_s27 }
  0x12   : > { %p1717_p4 = scmp.lt.s32.totalorder %s1708_s27, %s1708_s27 }
  0x13   : > { %p1699_p13 = pneg %p1576_p12 }
  0x14   : > { %p1718_p6 = por %p1717_p4, %p1716_p3 }
  0x15   : > { %p1711_p1 = pnand %p1709_p0, %p1699_p13 }
  0x17   : > { %p1712_p2 = pneg %p1711_p1 }
  0x19   : > { %p1719_p7 = pnand %p1718_p6, %p1712_p2 }
  0x1b   : > { %1722 = shalt.err (!%p1719_p7)
}
  0x1c   : > { %s1790_s28 = smov 64   ;;  %s1791_s29 = smov 4  }
  0x1d   : > { %1578 = dma.hbm_to_vmem [thread:$0]  (!%p1576_p12), %s2134_s1, 768, %s129_s26, [#allocation3], %s1790_s28, %s1790_s28, %s1791_s29  }
  0x1e   : > { %154 = sbr.rel (%p1867_p10) target bundleno = 5944 (0x1738), region = 32 }
  0x23   : > { %1766 = dma.done.wait (%p1583_p9), [#allocation3], 768  }
  0x24   : > { %1768 = vsyncadd (%p1583_p9), [#allocation3], 4294966528  ;;  %p177_p8 = scmp.lt.s32.totalorder %s1839_s16, 3  ;;  %v1792_v0 = vmov 0   ;;  %v1793_v1 = vmov 0.0   ;;  %vm1794_vm0 = vmmov 0   ;;  %v183_v7 = vlaneseq }
  0x25   : > { %1626 = vset.pattern.permute.xlu0 %v1792_v0  ;;  %1441 = vmatprep.subr.bf16.mxu1 %v1793_v1  ;;  %v1895_v3 = vld [vmem:[#allocation2 + $0x18] sm:$0xff]   ;;  %v1628_v4 = vld [vmem:[#allocation2 + $0x8] sm:$0xff]   ;;  %v1898_v5 = vld [vmem:[#allocation2 + $0x10] sm:$0xff]   ;;  %vm213_vm2 = vcmask 261120   ;;  %s1795_s17 = smov 64   ;;  %s1796_s19 = smov 32  }
  0x26   : > { %s178_s5 = scalar_select %p177_p8, %s1839_s16, 3  ;;  %1433 = vmatprep.subr.bf16.mxu0 %v1793_v1  ;;  %1445 = vmatprep.mubr.msk.bf16.mxu1 %vm1794_vm0, %v1793_v1  ;;  %v1630_v6 = vld [vmem:[#allocation2] sm:$0xff]   ;;  %v184_v8 = vand.u32 127, %v183_v7  ;;  %v1923_v33 = vld [vmem:[#allocation2 + $0x28] sm:$0xff]  }
  0x27   : > { %1437 = vmatprep.mubr.msk.bf16.mxu0 %vm1794_vm0, %v1793_v1  ;;  %1442 = vmatpush3.bf16.msra.mxu1 %v1895_v3  ;;  %v1347_v16 = vld [vmem:[%s2135_s2] ss:$0 sm:$0xff]  ;;  %s174_s20 = sand.u32 1, %s1779_s13   ;;  %v1953_v40 = vld [vmem:[%s2135_s2 + $0x1] sm:$0x1]  ;;  %s1379_s28 = sshll.u32 %s1839_s16, 7 }
  0x28   : > { %s1345_s6 = sshll.u32 %s178_s5, 3  ;;  %1443 = vmatprep.subr.bf16.mxu1 %v1793_v1  ;;  %1434 = vmatpush3.bf16.msra.mxu0 %v1628_v4  ;;  %v1926_v34 = vld [vmem:[#allocation2 + $0x20] sm:$0xff]   ;;  %s1344_s24 = sshll.u32 %s174_s20, 3 }
  0x29   : > { %s180_s9 = scalar_lea.vmem %s2133_s0, %s1345_s6  ;;  %1435 = vmatprep.subr.bf16.mxu0 %v1793_v1  ;;  %s1956_s27 = scalar_lea.vmem [#allocation5], %s1344_s24 }
  0x2a   : > { %v182_v2 = vld [vmem:[%s180_s9] sm:$0xff]  ;;  %s1267_s29 = sshll.u32 %s1956_s27, 4  ;;  %s2089_s5 = scalar_lea.hbm %s2136_s3, %s1379_s28  ;;  %s2091_s29 = int_to_ptr.vmem [resolvable:$true] %s1267_s29 }
  0x2b   : > { %186 = vperm.xlu0 %1626, %v182_v2   ;;  %1444 = vmatpush3.bf16.msra.mxu1 %v1898_v5  ;;  %s1254_s6 = scalar_lea.sflag [#allocation4], %s174_s20  ;;  %s1723_s16 = scalar_lea.vmem %s2091_s29, 128 }
  0x2c   : > { %1436 = vmatpush3.bf16.msra.mxu0 %v1630_v6  ;;  %1457 = vmatprep.subr.bf16.mxu1 %v1793_v1  ;;  %p1724_p6 = scmp.ne.s32.totalorder %s2091_s29, %s1723_s16  ;;  %s1797_s7 = smov [#allocation5]  }
  0x2d   : > { %1449 = vmatprep.subr.bf16.mxu0 %v1793_v1  ;;  %s1727_s8 = sshll.u32 %s1797_s7, 4  ;;  %s1728_s8 = int_to_ptr.vmem [resolvable:$false] %s1727_s8 }
  0x2e   : > { %1446 = vmatmul.mubr.bf16.vlgmr.msra.gmra.mxu1 %v1792_v0  ;;  %p1725_p9 = pnand %p1724_p6, %p1856_p5  ;;  %s1729_s9 = scalar_lea.vmem %s1728_s8, 256 }
  0x2f   : > { %1458 = vmatpush3.bf16.msra.mxu1 %v1895_v3  ;;  %1461 = vmatprep.mubr.msk.bf16.mxu1 %vm1794_vm0, %v1793_v1  ;;  %p1730_p11 = scmp.lt.s32.totalorder %s2091_s29, %s1728_s8  ;;  %p1731_p12 = scmp.lt.s32.totalorder %s1729_s9, %s1723_s16 }
  0x30   : > { %1459 = vmatprep.subr.bf16.mxu1 %v1793_v1  ;;  %p1726_p10 = pneg %p1725_p9 }
  0x31   : > { %p1732_p13 = por %p1731_p12, %p1730_p11 }
  0x33   : > { %1460 = vmatpush3.bf16.msra.mxu1 %v1898_v5  ;;  %p1733_p0 = pnand %p1732_p13, %p1726_p10 }
  0x34   : > { %1473 = vmatprep.subr.bf16.mxu1 %v1793_v1 }
  0xa6   : > { %v187_v9 = vpop.permute.xlu0 %186 }
  0xa7   : > { %vm188_vm1 = vcmp.eq.s32.totalorder %v187_v9, %v184_v8 }
  0xa8   : > { %v1346_v10 = vsel %vm188_vm1, 1.0, %v1793_v1 }
  0xa9   : > { %v191_v11 = vpack.c.bf16 %v1346_v10, %v1346_v10 }
  0xab   : > { %1438 = vmatmul.mubr.msk.bf16.vlgmr.msra.gmra.mxu0 %vm213_vm2, %v191_v11 }
  0xac   : > { %1453 = vmatprep.mubr.msk.bf16.mxu0 %vm1794_vm0, %v1793_v1  ;;  %1450 = vmatpush3.bf16.msra.mxu0 %v1923_v33 }
  0xad   : > { %1451 = vmatprep.subr.bf16.mxu0 %v1793_v1 }
  0xb0   : > { %1452 = vmatpush3.bf16.msra.mxu0 %v1926_v34 }
  0xb1   : > { %1465 = vmatprep.subr.bf16.mxu0 %v1793_v1 }
  0xee   : > { %v315_v12 = vpop.f32.mrf.mxu1 }
  0xf0   : > { %v1447_v13 = vpop.f32.mrf.mxu1 }
  0xf2   : > { %v318_v14 = vpop.f32.mrf.mxu1 }
  0xf4   : > { %v1448_v15 = vpop.f32.mrf.mxu1 }
 0x16b   : > { %v251_v17 = vpop.f32.mrf.mxu0 }
 0x16c   : > { %v1918_v18 = vadd.f32 %v1347_v16, %v251_v17 }
 0x16d   : > { %v1439_v19 = vpop.f32.mrf.mxu0 }
 0x16e   : > { %v321_v20 = vadd.f32 %v315_v12, %v1918_v18 }
 0x16f   : > { %v254_v21 = vpop.f32.mrf.mxu0 }
 0x170   : > { %1633 = vtanh.f32 %v321_v20  ;;  %v1353_v24 = vmul.f32 -1.442695, %v321_v20 }
 0x171   : > { %v1440_v22 = vpop.f32.mrf.mxu0 }
 0x172   : > { %1635 = vpow2.f32 %v1353_v24 }
 0x17d   : > { %v1634_v23 = vpop.eup %1633 }
 0x17e   : > { %331 = vrot.lane.b32.xlu0 %v1634_v23, %s1795_s17 }
 0x17f   : > { %v1636_v25 = vpop.eup %1635 }
 0x180   : > { %v325_v26 = vadd.f32 1.0, %v1636_v25 }
 0x182   : > { %1637 = vrcp.f32 %v325_v26 }
 0x18f   : > { %v1638_v27 = vpop.eup %1637 }
 0x190   : > { %v329_v30 = vmul.f32 0.0, %v1638_v27 }
 0x1f0   : > { %v332_v28 = vpop.permute.xlu0 %331 }
 0x1f1   : > { %v334_v29 = vmul.f32 %v1638_v27, %v332_v28 }
 0x1f3   : > { %336 = vrot.lane.b32.xlu1 %v334_v29, %s1796_s19 }
 0x265   : > { %v337_v31 = vpop.permute.xlu1 %336 }
 0x266   : > { %v339_v32 = vadd.f32 %v337_v31, %v329_v30 }
 0x268   : > { %1639 = vtanh.f32 %v339_v32  ;;  %v458_v59 = vrot.slane %v339_v32, 7 }
 0x275   : > { %v1640_v35 = vpop.eup %1639 }
 0x276   : > { %342 = vrot.lane.b32.xlu1 %v1640_v35, %s1795_s17 }
 0x2e8   : > { %v343_v36 = vpop.permute.xlu1 %342 }
 0x2e9   : > { %v345_v37 = vmul.f32 %v1638_v27, %v343_v36 }
 0x2eb   : > { %v346_v38 = vpack.c.bf16 %v345_v37, %v345_v37 }
 0x2ed   : > { %348 = vrot.lane.b32.xlu0 %v346_v38, %s1796_s19 }
 0x35f   : > { %v349_v39 = vpop.permute.xlu0 %348 }
 0x360   : > { %1454 = vmatmul.mubr.msk.bf16.vlgmr.msra.gmra.mxu0 %vm213_vm2, %v349_v39  ;;  %1462 = vmatmul.mubr.msk.bf16.vlgmr.msra.gmra.mxu1 %vm213_vm2, %v349_v39 }
 0x361   : > { %1474 = vmatpush3.bf16.msra.mxu1 %v1895_v3  ;;  %1466 = vmatpush3.bf16.msra.mxu0 %v1923_v33 }
 0x362   : > { %1475 = vmatprep.subr.bf16.mxu1 %v1793_v1  ;;  %1467 = vmatprep.subr.bf16.mxu0 %v1793_v1 }
 0x363   : > { %1477 = vmatprep.mubr.msk.bf16.mxu1 %vm1794_vm0, %v1793_v1  ;;  %1469 = vmatprep.mubr.msk.bf16.mxu0 %vm1794_vm0, %v1793_v1 }
 0x365   : > { %1476 = vmatpush3.bf16.msra.mxu1 %v1898_v5  ;;  %1468 = vmatpush3.bf16.msra.mxu0 %v1926_v34 }
 0x366   : > { %1489 = vmatprep.subr.bf16.mxu1 %v1793_v1  ;;  %1481 = vmatprep.subr.bf16.mxu0 %v1793_v1 }
 0x420   : > { %v399_v41 = vpop.f32.mrf.mxu0  ;;  %v440_v42 = vpop.f32.mrf.mxu1 }
 0x421   : > { %v400_v43 = vadd.f32 %v399_v41, %v1953_v40  ;;  %v447_v44 = vrot.slane %v440_v42, 7 }
 0x422   : > { %v1455_v45 = vpop.f32.mrf.mxu0  ;;  %v1463_v46 = vpop.f32.mrf.mxu1 }
 0x423   : > { %405 = vst [vmem:[%s1956_s27] sm:$0x1] %v400_v43  ;;  %v449_v47 = vadd.f32 %v447_v44, %v1918_v18 }
 0x424   : > { %v402_v48 = vpop.f32.mrf.mxu0  ;;  %v443_v49 = vpop.f32.mrf.mxu1 }
 0x425   : > { %1641 = vtanh.f32 %v449_v47  ;;  %v1358_v53 = vmul.f32 -1.442695, %v449_v47 }
 0x426   : > { %v1456_v50 = vpop.f32.mrf.mxu0  ;;  %v1464_v51 = vpop.f32.mrf.mxu1 }
 0x427   : > { %1643 = vpow2.f32 %v1358_v53 }
 0x432   : > { %v1642_v52 = vpop.eup %1641 }
 0x433   : > { %462 = vrot.lane.b32.xlu1 %v1642_v52, %s1795_s17 }
 0x434   : > { %v1644_v54 = vpop.eup %1643 }
 0x435   : > { %v453_v55 = vadd.f32 1.0, %v1644_v54 }
 0x437   : > { %1645 = vrcp.f32 %v453_v55 }
 0x444   : > { %v1646_v56 = vpop.eup %1645 }
 0x445   : > { %v460_v60 = vmul.f32 %v1646_v56, %v458_v59 }
 0x4a5   : > { %v463_v57 = vpop.permute.xlu1 %462 }
 0x4a6   : > { %v465_v58 = vmul.f32 %v1646_v56, %v463_v57 }
 0x4a8   : > { %467 = vrot.lane.b32.xlu0 %v465_v58, %s1796_s19 }
 0x51a   : > { %v468_v61 = vpop.permute.xlu0 %467 }
 0x51b   : > { %v470_v62 = vadd.f32 %v468_v61, %v460_v60 }
 0x51d   : > { %1647 = vtanh.f32 %v470_v62  ;;  %v579_v27 = vrot.slane %v470_v62, 7 }
 0x52a   : > { %v1648_v63 = vpop.eup %1647 }
 0x52b   : > { %473 = vrot.lane.b32.xlu1 %v1648_v63, %s1795_s17 }
 0x59d   : > { %v474_v0 = vpop.permute.xlu1 %473 }
 0x59e   : > { %v476_v2 = vmul.f32 %v1646_v56, %v474_v0 }
 0x5a0   : > { %v477_v4 = vpack.c.bf16 %v476_v2, %v476_v2 }
 0x5a2   : > { %v479_v6 = vshrl.u32 %v477_v4, 16 }
 0x5a4   : > { %481 = vrot.lane.b32.xlu0 %v479_v6, %s1796_s19 }
 0x616   : > { %v482_v7 = vpop.permute.xlu0 %481 }
 0x617   : > { %1470 = vmatmul.mubr.msk.bf16.vlgmr.msra.gmra.mxu0 %vm213_vm2, %v482_v7  ;;  %1478 = vmatmul.mubr.msk.bf16.vlgmr.msra.gmra.mxu1 %vm213_vm2, %v482_v7 }
 0x618   : > { %1490 = vmatpush3.bf16.msra.mxu1 %v1895_v3  ;;  %1482 = vmatpush3.bf16.msra.mxu0 %v1923_v33 }
 0x619   : > { %1491 = vmatprep.subr.bf16.mxu1 %v1793_v1  ;;  %1483 = vmatprep.subr.bf16.mxu0 %v1793_v1 }
 0x61a   : > { %1493 = vmatprep.mubr.msk.bf16.mxu1 %vm1794_vm0, %v1793_v1  ;;  %1485 = vmatprep.mubr.msk.bf16.mxu0 %vm1794_vm0, %v1793_v1 }
 0x61c   : > { %1492 = vmatpush3.bf16.msra.mxu1 %v1898_v5  ;;  %1484 = vmatpush3.bf16.msra.mxu0 %v1926_v34 }
 0x61d   : > { %1505 = vmatprep.subr.bf16.mxu1 %v1793_v1  ;;  %1497 = vmatprep.subr.bf16.mxu0 %v1793_v1 }
 0x6d7   : > { %v520_v8 = vpop.f32.mrf.mxu0  ;;  %v561_v9 = vpop.f32.mrf.mxu1 }
 0x6d8   : > { %v521_v10 = vadd.f32 %v520_v8, %v1953_v40  ;;  %v568_v11 = vrot.slane %v561_v9, 6 }
 0x6d9   : > { %v1471_v12 = vpop.f32.mrf.mxu0  ;;  %v1479_v13 = vpop.f32.mrf.mxu1 }
 0x6da   : > { %526 = vst [vmem:[%s1956_s27 + $0x1] sm:$0x1] %v521_v10  ;;  %v570_v14 = vadd.f32 %v568_v11, %v1918_v18 }
 0x6db   : > { %v523_v15 = vpop.f32.mrf.mxu0  ;;  %v564_v16 = vpop.f32.mrf.mxu1 }
 0x6dc   : > { %1649 = vtanh.f32 %v570_v14  ;;  %v1361_v21 = vmul.f32 -1.442695, %v570_v14 }
 0x6dd   : > { %v1472_v17 = vpop.f32.mrf.mxu0  ;;  %v1480_v19 = vpop.f32.mrf.mxu1 }
 0x6de   : > { %1651 = vpow2.f32 %v1361_v21 }
 0x6e9   : > { %v1650_v20 = vpop.eup %1649 }
 0x6ea   : > { %583 = vrot.lane.b32.xlu1 %v1650_v20, %s1795_s17 }
 0x6eb   : > { %v1652_v22 = vpop.eup %1651 }
 0x6ec   : > { %v574_v23 = vadd.f32 1.0, %v1652_v22 }
 0x6ee   : > { %1653 = vrcp.f32 %v574_v23 }
 0x6fb   : > { %v1654_v24 = vpop.eup %1653 }
 0x6fc   : > { %v581_v28 = vmul.f32 %v1654_v24, %v579_v27 }
 0x75c   : > { %v584_v25 = vpop.permute.xlu1 %583 }
 0x75d   : > { %v586_v26 = vmul.f32 %v1654_v24, %v584_v25 }
 0x75f   : > { %588 = vrot.lane.b32.xlu0 %v586_v26, %s1796_s19 }
 0x7d1   : > { %v589_v29 = vpop.permute.xlu0 %588 }
 0x7d2   : > { %v591_v30 = vadd.f32 %v589_v29, %v581_v28 }
 0x7d4   : > { %1655 = vtanh.f32 %v591_v30  ;;  %v699_v58 = vrot.slane %v591_v30, 7 }
 0x7e1   : > { %v1656_v31 = vpop.eup %1655 }
 0x7e2   : > { %594 = vrot.lane.b32.xlu1 %v1656_v31, %s1795_s17 }
 0x854   : > { %v595_v32 = vpop.permute.xlu1 %594 }
 0x855   : > { %v597_v35 = vmul.f32 %v1654_v24, %v595_v32 }
 0x857   : > { %v598_v36 = vpack.c.bf16 %v597_v35, %v597_v35 }
 0x859   : > { %v600_v37 = vrot.slane %v598_v36, 1 }
 0x85b   : > { %601 = vrot.lane.b32.xlu0 %v600_v37, %s1796_s19 }
 0x8cd   : > { %v602_v38 = vpop.permute.xlu0 %601 }
 0x8ce   : > { %1486 = vmatmul.mubr.msk.bf16.vlgmr.msra.gmra.mxu0 %vm213_vm2, %v602_v38  ;;  %1494 = vmatmul.mubr.msk.bf16.vlgmr.msra.gmra.mxu1 %vm213_vm2, %v602_v38 }
 0x8cf   : > { %1506 = vmatpush3.bf16.msra.mxu1 %v1895_v3  ;;  %1498 = vmatpush3.bf16.msra.mxu0 %v1923_v33 }
 0x8d0   : > { %1507 = vmatprep.subr.bf16.mxu1 %v1793_v1  ;;  %1499 = vmatprep.subr.bf16.mxu0 %v1793_v1 }
 0x8d1   : > { %1509 = vmatprep.mubr.msk.bf16.mxu1 %vm1794_vm0, %v1793_v1  ;;  %1501 = vmatprep.mubr.msk.bf16.mxu0 %vm1794_vm0, %v1793_v1 }
 0x8d3   : > { %1508 = vmatpush3.bf16.msra.mxu1 %v1898_v5  ;;  %1500 = vmatpush3.bf16.msra.mxu0 %v1926_v34 }
 0x8d4   : > { %1521 = vmatprep.subr.bf16.mxu1 %v1793_v1  ;;  %1513 = vmatprep.subr.bf16.mxu0 %v1793_v1 }
 0x98e   : > { %v640_v39 = vpop.f32.mrf.mxu0  ;;  %v681_v41 = vpop.f32.mrf.mxu1 }
 0x98f   : > { %v641_v42 = vadd.f32 %v640_v39, %v1953_v40  ;;  %v688_v43 = vrot.slane %v681_v41, 5 }
 0x990   : > { %v1487_v44 = vpop.f32.mrf.mxu0  ;;  %v1495_v45 = vpop.f32.mrf.mxu1 }
 0x991   : > { %646 = vst [vmem:[%s1956_s27 + $0x2] sm:$0x1] %v641_v42  ;;  %v690_v46 = vadd.f32 %v688_v43, %v1918_v18 }
 0x992   : > { %v643_v47 = vpop.f32.mrf.mxu0  ;;  %v684_v48 = vpop.f32.mrf.mxu1 }
 0x993   : > { %1657 = vtanh.f32 %v690_v46  ;;  %v1364_v52 = vmul.f32 -1.442695, %v690_v46 }
 0x994   : > { %v1488_v49 = vpop.f32.mrf.mxu0  ;;  %v1496_v50 = vpop.f32.mrf.mxu1 }
 0x995   : > { %1659 = vpow2.f32 %v1364_v52 }
 0x9a0   : > { %v1658_v51 = vpop.eup %1657 }
 0x9a1   : > { %703 = vrot.lane.b32.xlu1 %v1658_v51, %s1795_s17 }
 0x9a2   : > { %v1660_v53 = vpop.eup %1659 }
 0x9a3   : > { %v694_v54 = vadd.f32 1.0, %v1660_v53 }
 0x9a5   : > { %1661 = vrcp.f32 %v694_v54 }
 0x9b2   : > { %v1662_v55 = vpop.eup %1661 }
 0x9b3   : > { %v701_v59 = vmul.f32 %v1662_v55, %v699_v58 }
 0xa13   : > { %v704_v56 = vpop.permute.xlu1 %703 }
 0xa14   : > { %v706_v57 = vmul.f32 %v1662_v55, %v704_v56 }
 0xa16   : > { %708 = vrot.lane.b32.xlu0 %v706_v57, %s1796_s19 }
 0xa88   : > { %v709_v60 = vpop.permute.xlu0 %708 }
 0xa89   : > { %v711_v61 = vadd.f32 %v709_v60, %v701_v59 }
 0xa8b   : > { %1663 = vtanh.f32 %v711_v61  ;;  %v821_v27 = vrot.slane %v711_v61, 7 }
 0xa98   : > { %v1664_v62 = vpop.eup %1663 }
 0xa99   : > { %714 = vrot.lane.b32.xlu1 %v1664_v62, %s1795_s17 }
 0xb0b   : > { %v715_v63 = vpop.permute.xlu1 %714 }
 0xb0c   : > { %v717_v0 = vmul.f32 %v1662_v55, %v715_v63 }
 0xb0e   : > { %v718_v2 = vpack.c.bf16 %v717_v0, %v717_v0 }
 0xb10   : > { %v720_v4 = vshrl.u32 %v718_v2, 16 }
 0xb12   : > { %v722_v6 = vrot.slane %v720_v4, 1 }
 0xb14   : > { %723 = vrot.lane.b32.xlu0 %v722_v6, %s1796_s19 }
 0xb86   : > { %v724_v7 = vpop.permute.xlu0 %723 }
 0xb87   : > { %1502 = vmatmul.mubr.msk.bf16.vlgmr.msra.gmra.mxu0 %vm213_vm2, %v724_v7  ;;  %1510 = vmatmul.mubr.msk.bf16.vlgmr.msra.gmra.mxu1 %vm213_vm2, %v724_v7 }
 0xb88   : > { %1522 = vmatpush3.bf16.msra.mxu1 %v1895_v3  ;;  %1514 = vmatpush3.bf16.msra.mxu0 %v1923_v33 }
 0xb89   : > { %1523 = vmatprep.subr.bf16.mxu1 %v1793_v1  ;;  %1515 = vmatprep.subr.bf16.mxu0 %v1793_v1 }
 0xb8a   : > { %1525 = vmatprep.mubr.msk.bf16.mxu1 %vm1794_vm0, %v1793_v1  ;;  %1517 = vmatprep.mubr.msk.bf16.mxu0 %vm1794_vm0, %v1793_v1 }
 0xb8c   : > { %1524 = vmatpush3.bf16.msra.mxu1 %v1898_v5  ;;  %1516 = vmatpush3.bf16.msra.mxu0 %v1926_v34 }
 0xb8d   : > { %1537 = vmatprep.subr.bf16.mxu1 %v1793_v1  ;;  %1529 = vmatprep.subr.bf16.mxu0 %v1793_v1 }
 0xc47   : > { %v762_v8 = vpop.f32.mrf.mxu0  ;;  %v803_v9 = vpop.f32.mrf.mxu1 }
 0xc48   : > { %v763_v10 = vadd.f32 %v762_v8, %v1953_v40  ;;  %v810_v11 = vrot.slane %v803_v9, 4 }
 0xc49   : > { %v1503_v12 = vpop.f32.mrf.mxu0  ;;  %v1511_v13 = vpop.f32.mrf.mxu1 }
 0xc4a   : > { %768 = vst [vmem:[%s1956_s27 + $0x3] sm:$0x1] %v763_v10  ;;  %v812_v14 = vadd.f32 %v810_v11, %v1918_v18 }
 0xc4b   : > { %v765_v15 = vpop.f32.mrf.mxu0  ;;  %v806_v16 = vpop.f32.mrf.mxu1 }
 0xc4c   : > { %1665 = vtanh.f32 %v812_v14  ;;  %v1367_v21 = vmul.f32 -1.442695, %v812_v14 }
 0xc4d   : > { %v1504_v17 = vpop.f32.mrf.mxu0  ;;  %v1512_v19 = vpop.f32.mrf.mxu1 }
 0xc4e   : > { %1667 = vpow2.f32 %v1367_v21 }
 0xc59   : > { %v1666_v20 = vpop.eup %1665 }
 0xc5a   : > { %825 = vrot.lane.b32.xlu1 %v1666_v20, %s1795_s17 }
 0xc5b   : > { %v1668_v22 = vpop.eup %1667 }
 0xc5c   : > { %v816_v23 = vadd.f32 1.0, %v1668_v22 }
 0xc5e   : > { %1669 = vrcp.f32 %v816_v23 }
 0xc6b   : > { %v1670_v24 = vpop.eup %1669 }
 0xc6c   : > { %v823_v28 = vmul.f32 %v1670_v24, %v821_v27 }
 0xccc   : > { %v826_v25 = vpop.permute.xlu1 %825 }
 0xccd   : > { %v828_v26 = vmul.f32 %v1670_v24, %v826_v25 }
 0xccf   : > { %830 = vrot.lane.b32.xlu0 %v828_v26, %s1796_s19 }
 0xd41   : > { %v831_v29 = vpop.permute.xlu0 %830 }
 0xd42   : > { %v833_v30 = vadd.f32 %v831_v29, %v823_v28 }
 0xd44   : > { %1671 = vtanh.f32 %v833_v30  ;;  %v941_v58 = vrot.slane %v833_v30, 7 }
 0xd51   : > { %v1672_v31 = vpop.eup %1671 }
 0xd52   : > { %836 = vrot.lane.b32.xlu1 %v1672_v31, %s1795_s17 }
 0xdc4   : > { %v837_v32 = vpop.permute.xlu1 %836 }
 0xdc5   : > { %v839_v35 = vmul.f32 %v1670_v24, %v837_v32 }
 0xdc7   : > { %v840_v36 = vpack.c.bf16 %v839_v35, %v839_v35 }
 0xdc9   : > { %v842_v37 = vrot.slane %v840_v36, 2 }
 0xdcb   : > { %843 = vrot.lane.b32.xlu0 %v842_v37, %s1796_s19 }
 0xe3d   : > { %v844_v38 = vpop.permute.xlu0 %843 }
 0xe3e   : > { %1518 = vmatmul.mubr.msk.bf16.vlgmr.msra.gmra.mxu0 %vm213_vm2, %v844_v38  ;;  %1526 = vmatmul.mubr.msk.bf16.vlgmr.msra.gmra.mxu1 %vm213_vm2, %v844_v38 }
 0xe3f   : > { %1538 = vmatpush3.bf16.msra.mxu1 %v1895_v3  ;;  %1530 = vmatpush3.bf16.msra.mxu0 %v1923_v33 }
 0xe40   : > { %1539 = vmatprep.subr.bf16.mxu1 %v1793_v1  ;;  %1531 = vmatprep.subr.bf16.mxu0 %v1793_v1 }
 0xe41   : > { %1541 = vmatprep.mubr.msk.bf16.mxu1 %vm1794_vm0, %v1793_v1  ;;  %1533 = vmatprep.mubr.msk.bf16.mxu0 %vm1794_vm0, %v1793_v1 }
 0xe43   : > { %1540 = vmatpush3.bf16.msra.mxu1 %v1898_v5  ;;  %1532 = vmatpush3.bf16.msra.mxu0 %v1926_v34 }
 0xe44   : > { %1553 = vmatprep.subr.bf16.mxu1 %v1793_v1  ;;  %1545 = vmatprep.subr.bf16.mxu0 %v1793_v1 }
 0xefe   : > { %v882_v39 = vpop.f32.mrf.mxu0  ;;  %v923_v41 = vpop.f32.mrf.mxu1 }
 0xeff   : > { %v883_v42 = vadd.f32 %v882_v39, %v1953_v40  ;;  %v930_v43 = vrot.slane %v923_v41, 3 }
 0xf00   : > { %v1519_v44 = vpop.f32.mrf.mxu0  ;;  %v1527_v45 = vpop.f32.mrf.mxu1 }
 0xf01   : > { %888 = vst [vmem:[%s1956_s27 + $0x4] sm:$0x1] %v883_v42  ;;  %v932_v46 = vadd.f32 %v930_v43, %v1918_v18 }
 0xf02   : > { %v885_v47 = vpop.f32.mrf.mxu0  ;;  %v926_v48 = vpop.f32.mrf.mxu1 }
 0xf03   : > { %1673 = vtanh.f32 %v932_v46  ;;  %v1370_v52 = vmul.f32 -1.442695, %v932_v46 }
 0xf04   : > { %v1520_v49 = vpop.f32.mrf.mxu0  ;;  %v1528_v50 = vpop.f32.mrf.mxu1 }
 0xf05   : > { %1675 = vpow2.f32 %v1370_v52 }
 0xf10   : > { %v1674_v51 = vpop.eup %1673 }
 0xf11   : > { %945 = vrot.lane.b32.xlu1 %v1674_v51, %s1795_s17 }
 0xf12   : > { %v1676_v53 = vpop.eup %1675 }
 0xf13   : > { %v936_v54 = vadd.f32 1.0, %v1676_v53 }
 0xf15   : > { %1677 = vrcp.f32 %v936_v54 }
 0xf22   : > { %v1678_v55 = vpop.eup %1677 }
 0xf23   : > { %v943_v59 = vmul.f32 %v1678_v55, %v941_v58 }
 0xf83   : > { %v946_v56 = vpop.permute.xlu1 %945 }
 0xf84   : > { %v948_v57 = vmul.f32 %v1678_v55, %v946_v56 }
 0xf86   : > { %950 = vrot.lane.b32.xlu0 %v948_v57, %s1796_s19 }
 0xff8   : > { %v951_v60 = vpop.permute.xlu0 %950 }
 0xff9   : > { %v953_v61 = vadd.f32 %v951_v60, %v943_v59 }
 0xffb   : > { %1679 = vtanh.f32 %v953_v61  ;;  %v1063_v25 = vrot.slane %v953_v61, 7 }
0x1008   : > { %v1680_v62 = vpop.eup %1679 }
0x1009   : > { %956 = vrot.lane.b32.xlu1 %v1680_v62, %s1795_s17 }
0x107b   : > { %v957_v63 = vpop.permute.xlu1 %956 }
0x107c   : > { %v959_v0 = vmul.f32 %v1678_v55, %v957_v63 }
0x107e   : > { %v960_v2 = vpack.c.bf16 %v959_v0, %v959_v0 }
0x1080   : > { %v962_v4 = vshrl.u32 %v960_v2, 16 }
0x1082   : > { %v964_v6 = vrot.slane %v962_v4, 2 }
0x1084   : > { %965 = vrot.lane.b32.xlu0 %v964_v6, %s1796_s19 }
0x10f6   : > { %v966_v7 = vpop.permute.xlu0 %965 }
0x10f7   : > { %1534 = vmatmul.mubr.msk.bf16.vlgmr.msra.gmra.mxu0 %vm213_vm2, %v966_v7  ;;  %1542 = vmatmul.mubr.msk.bf16.vlgmr.msra.gmra.mxu1 %vm213_vm2, %v966_v7 }
0x10f8   : > { %1554 = vmatpush3.bf16.msra.mxu1 %v1895_v3  ;;  %1546 = vmatpush3.bf16.msra.mxu0 %v1923_v33 }
0x10f9   : > { %1555 = vmatprep.subr.bf16.mxu1 %v1793_v1  ;;  %1547 = vmatprep.subr.bf16.mxu0 %v1793_v1 }
0x10fa   : > { %1557 = vmatprep.mubr.msk.bf16.mxu1 %vm1794_vm0, %v1793_v1  ;;  %1549 = vmatprep.mubr.msk.bf16.mxu0 %vm1794_vm0, %v1793_v1 }
0x10fc   : > { %1556 = vmatpush3.bf16.msra.mxu1 %v1898_v5  ;;  %1548 = vmatpush3.bf16.msra.mxu0 %v1926_v34 }
0x10fd   : > { %1561 = vmatprep.subr.bf16.mxu0 %v1793_v1 }
0x11b7   : > { %v1004_v8 = vpop.f32.mrf.mxu0  ;;  %v1045_v3 = vpop.f32.mrf.mxu1 }
0x11b8   : > { %v1005_v9 = vadd.f32 %v1004_v8, %v1953_v40  ;;  %v1052_v10 = vrot.slane %v1045_v3, 2 }
0x11b9   : > { %v1535_v11 = vpop.f32.mrf.mxu0  ;;  %v1543_v12 = vpop.f32.mrf.mxu1 }
0x11ba   : > { %1010 = vst [vmem:[%s1956_s27 + $0x5] sm:$0x1] %v1005_v9  ;;  %v1054_v13 = vadd.f32 %v1052_v10, %v1918_v18 }
0x11bb   : > { %v1007_v14 = vpop.f32.mrf.mxu0  ;;  %v1048_v15 = vpop.f32.mrf.mxu1 }
0x11bc   : > { %1681 = vtanh.f32 %v1054_v13  ;;  %v1373_v19 = vmul.f32 -1.442695, %v1054_v13 }
0x11bd   : > { %v1536_v16 = vpop.f32.mrf.mxu0  ;;  %v1544_v17 = vpop.f32.mrf.mxu1 }
0x11be   : > { %1683 = vpow2.f32 %v1373_v19 }
0x11c9   : > { %v1682_v5 = vpop.eup %1681 }
0x11ca   : > { %1067 = vrot.lane.b32.xlu1 %v1682_v5, %s1795_s17 }
0x11cb   : > { %v1684_v20 = vpop.eup %1683 }
0x11cc   : > { %v1058_v21 = vadd.f32 1.0, %v1684_v20 }
0x11ce   : > { %1685 = vrcp.f32 %v1058_v21 }
0x11db   : > { %v1686_v22 = vpop.eup %1685 }
0x11dc   : > { %v1065_v26 = vmul.f32 %v1686_v22, %v1063_v25 }
0x123c   : > { %v1068_v23 = vpop.permute.xlu1 %1067 }
0x123d   : > { %v1070_v24 = vmul.f32 %v1686_v22, %v1068_v23 }
0x123f   : > { %1072 = vrot.lane.b32.xlu0 %v1070_v24, %s1796_s19 }
0x12b1   : > { %v1073_v27 = vpop.permute.xlu0 %1072 }
0x12b2   : > { %v1075_v28 = vadd.f32 %v1073_v27, %v1065_v26 }
0x12b4   : > { %1687 = vtanh.f32 %v1075_v28 }
0x12c1   : > { %v1688_v29 = vpop.eup %1687 }
0x12c2   : > { %1078 = vrot.lane.b32.xlu1 %v1688_v29, %s1795_s17 }
0x1334   : > { %v1079_v30 = vpop.permute.xlu1 %1078 }
0x1335   : > { %v1081_v31 = vmul.f32 %v1686_v22, %v1079_v30 }
0x1337   : > { %v1082_v32 = vpack.c.bf16 %v1081_v31, %v1081_v31 }
0x1339   : > { %v1084_v35 = vrot.slane %v1082_v32, 3 }
0x133b   : > { %1085 = vrot.lane.b32.xlu0 %v1084_v35, %s1796_s19 }
0x13ad   : > { %v1086_v36 = vpop.permute.xlu0 %1085 }
0x13ae   : > { %1550 = vmatmul.mubr.msk.bf16.vlgmr.msra.gmra.mxu0 %vm213_vm2, %v1086_v36  ;;  %1558 = vmatmul.mubr.msk.bf16.vlgmr.msra.gmra.mxu1 %vm213_vm2, %v1086_v36 }
0x13af   : > { %1562 = vmatpush3.bf16.msra.mxu0 %v1923_v33  ;;  %1565 = vmatprep.mubr.msk.bf16.mxu0 %vm1794_vm0, %v1793_v1 }
0x13b0   : > { %1563 = vmatprep.subr.bf16.mxu0 %v1793_v1 }
0x13b3   : > { %1564 = vmatpush3.bf16.msra.mxu0 %v1926_v34 }
0x146e   : > { %v1124_v37 = vpop.f32.mrf.mxu0  ;;  %v1165_v38 = vpop.f32.mrf.mxu1 }
0x146f   : > { %v1125_v39 = vadd.f32 %v1124_v37, %v1953_v40  ;;  %v1172_v41 = vrot.slane %v1165_v38, 1 }
0x1470   : > { %v1551_v42 = vpop.f32.mrf.mxu0  ;;  %v1559_v43 = vpop.f32.mrf.mxu1 }
0x1471   : > { %1130 = vst [vmem:[%s1956_s27 + $0x6] sm:$0x1] %v1125_v39  ;;  %v1174_v44 = vadd.f32 %v1172_v41, %v1918_v18  ;;  %v1183_v18 = vrot.slane %v1075_v28, 7 }
0x1472   : > { %v1127_v45 = vpop.f32.mrf.mxu0  ;;  %v1168_v46 = vpop.f32.mrf.mxu1 }
0x1473   : > { %1689 = vtanh.f32 %v1174_v44  ;;  %v1376_v1 = vmul.f32 -1.442695, %v1174_v44 }
0x1474   : > { %v1552_v33 = vpop.f32.mrf.mxu0  ;;  %v1560_v47 = vpop.f32.mrf.mxu1 }
0x1475   : > { %1691 = vpow2.f32 %v1376_v1 }
0x1480   : > { %v1690_v48 = vpop.eup %1689 }
0x1481   : > { %1187 = vrot.lane.b32.xlu1 %v1690_v48, %s1795_s17 }
0x1482   : > { %v1692_v34 = vpop.eup %1691 }
0x1483   : > { %v1178_v49 = vadd.f32 1.0, %v1692_v34 }
0x1485   : > { %1693 = vrcp.f32 %v1178_v49 }
0x1492   : > { %v1694_v50 = vpop.eup %1693 }
0x1493   : > { %v1185_v53 = vmul.f32 %v1694_v50, %v1183_v18 }
0x14f3   : > { %v1188_v51 = vpop.permute.xlu1 %1187 }
0x14f4   : > { %v1190_v52 = vmul.f32 %v1694_v50, %v1188_v51 }
0x14f6   : > { %1192 = vrot.lane.b32.xlu0 %v1190_v52, %s1796_s19 }
0x1568   : > { %v1193_v54 = vpop.permute.xlu0 %1192 }
0x1569   : > { %v1195_v55 = vadd.f32 %v1193_v54, %v1185_v53 }
0x156b   : > { %1695 = vtanh.f32 %v1195_v55 }
0x1578   : > { %v1696_v56 = vpop.eup %1695 }
0x1579   : > { %1198 = vrot.lane.b32.xlu1 %v1696_v56, %s1795_s17 }
0x15eb   : > { %v1199_v57 = vpop.permute.xlu1 %1198 }
0x15ec   : > { %v1201_v58 = vmul.f32 %v1694_v50, %v1199_v57 }
0x15ee   : > { %v1202_v59 = vpack.c.bf16 %v1201_v58, %v1201_v58 }
0x15f0   : > { %v1204_v60 = vshrl.u32 %v1202_v59, 16 }
0x15f2   : > { %v1206_v61 = vrot.slane %v1204_v60, 3 }
0x15f4   : > { %1207 = vrot.lane.b32.xlu0 %v1206_v61, %s1796_s19 }
0x1666   : > { %v1208_v62 = vpop.permute.xlu0 %1207 }
0x1667   : > { %1566 = vmatmul.mubr.msk.bf16.vlgmr.msra.gmra.mxu0 %vm213_vm2, %v1208_v62 }
0x1727   : > { %v1246_v63 = vpop.f32.mrf.mxu0 }
0x1728   : > { %v1247_v0 = vadd.f32 %v1246_v63, %v1953_v40 }
0x1729   : > { %v1567_v2 = vpop.f32.mrf.mxu0 }
0x172a   : > { %1252 = vst [vmem:[%s1956_s27 + $0x7] sm:$0x1] %v1247_v0 }
0x172b   : > { %v1249_v4 = vpop.f32.mrf.mxu0 }
0x172c   : > { %1736 = shalt.err (!%p1733_p0)
}
0x172d   : > { %s1737_s10 = scalar_lea.hbm %s2089_s5, 128  ;;  %s1741_s19 = scalar_lea.hbm %s2136_s3, 512 }
0x172e   : > { %p1738_p1 = scmp.ne.s32.totalorder %s2089_s5, %s1737_s10  ;;  %p1742_p4 = scmp.lt.s32.totalorder %s2089_s5, %s2136_s3 }
0x172f   : > { %p1743_p7 = scmp.lt.s32.totalorder %s1741_s19, %s1737_s10 }
0x1730   : > { %p1739_p2 = pnand %p1738_p1, %p1856_p5 }
0x1731   : > { %p1744_p8 = por %p1743_p7, %p1742_p4 }
0x1732   : > { %p1740_p3 = pneg %p1739_p2 }
0x1734   : > { %p1745_p6 = pnand %p1744_p8, %p1740_p3 }
0x1736   : > { %1748 = shalt.err (!%p1745_p6)
}
0x1737   : > { %1573 = dma.vmem_to_hbm [thread:$0]  (%p1856_p5), %s2091_s29, 128, %s2089_s5, %s1254_s6   ;;  %v1568_v40 = vpop.f32.mrf.mxu0 }
0x1738 PF: > { %p1585_p9 = scmp.ge.s32.totalorder %s1787_s15, 2  ;;  %s1279_s25 = sand.u32 1, %s1775_s12  }
0x1739   : > { %p2140_p10 = scmp.ne.s32.totalorder %s2138_s23, 0  ;;  %s1280_s26 = scalar_lea.sflag [#allocation4], %s1279_s25 }
0x173b   : > { %p1580_p11 = pnand %p1585_p9, %p2140_p10 }
0x173d   : > { %p1581_p12 = pneg %p1580_p11 }
0x173f   : > { %1770 = dma.done.wait (%p1581_p12), %s1280_s26, 128  }
0x1740   : > { %1772 = vsyncadd (%p1581_p12), %s1280_s26, 4294967168  ;;  %p14_p13 = scmp.ge.s32.totalorder %s1843_s18, 6   ;;  %s2141_s12 = smov %s1779_s13 }
0x1741   : > { %s2142_s13 = smov %s1783_s14  ;;  %s2143_s14 = smov %s1854_s21 }
0x1742   : > { %s2144_s15 = smov %s1843_s18  ;;  %16 = sbr.rel (!%p14_p13) target bundleno = 4 (0x4), region = 72 }
0x1747   :  { %1285 = vsyncpa [#allocation3], 1 }
0x1748   :  { %1287 = vsyncpa [#allocation3 + $0x1], 1 }
0x1749   :  { %1288 = vsyncpa [#allocation4], 1 }
0x174a   :  { %1290 = vsyncpa [#allocation4 + $0x1], 1 }

</bundles_post_ra>
